<compile_context>
chip_gen: v7x
topology: tpu7x:2x2x1
jax: 0.10.0
libtpu: 0.0.40
codegen_flags: <defaults>
</compile_context>

<pallas_src>
import jax
import jax.numpy as jnp
from jax.experimental import pallas as pl
from jax.experimental.pallas import tpu as pltpu


def _round_up(x, m):
    return (x + m - 1) // m * m


def _pick_batch_block(n):
    """Images per grid step: amortize per-step overhead, keep >=2 steps."""
    if n >= 16:
        return 8
    if n >= 2:
        return max(1, n // 2)
    return 1


def _make_kernel(B, H, W, K1, C1, C2, KH, KW):
    """Fused kernel for a block of B images. All sizes are Python constants."""
    H1, W1 = H // 2, W // 2          # after pool1 == conv2 spatial
    Ho, Wo = H1 // 2, W1 // 2        # after pool2
    H1p, W1p = H1 + 2, W1 + 2        # zero-padded pooled map for conv2

    def kernel(xcol_ref, w1_ref, b1_ref, w2_ref, b2_ref, out_ref,
               p1_ref, s3_ref):
        # ---------------- conv1: one bf16 matmul + bias + ReLU -------------
        a1 = jnp.dot(xcol_ref[...], w1_ref[...],
                     preferred_element_type=jnp.float32)
        a1 = jnp.maximum(a1 + b1_ref[...], 0.0)            # (B*H*W, C1)

        # ---------------- maxpool1 (rows pre-ordered (b, hi, wi, ph, pw)) --
        # The four 2x2-window taps are four contiguous 64-row quarters.
        q = a1.reshape(B, 4, H1 * W1, C1)
        pooled1 = jnp.maximum(jnp.maximum(q[:, 0], q[:, 1]),
                              jnp.maximum(q[:, 2], q[:, 3]))  # (B, H1*W1, C1)

        # ---------------- zero-padded pooled map ('same' pad for conv2) ----
        # Scratch persists across grid steps -> re-zero the border each step.
        p1_ref[...] = jnp.zeros((B, H1p, W1p, C1), jnp.float32)
        p1_ref[:, pl.ds(1, H1), pl.ds(1, W1), :] = (
            pooled1.reshape(B, H1, W1, C1))

        # ---------------- conv2 im2col (y-parity-major) + one matmul -------
        # Rows ordered (b, yi, py, x) so the H-half of pool2 is a max over
        # two contiguous halves (no scatter/gather afterwards).
        halves = []
        for yi in range(2):
            taps = []
            for kh in range(KH):
                for kw in range(KW):
                    t = p1_ref[:, pl.ds(yi + kh, Ho, 2), pl.ds(kw, W1), :]
                    taps.append(t.reshape(B, Ho * W1, C1))   # (B, 32, C1)
            halves.append(jnp.concatenate(taps, axis=-1))    # (B, 32, 9*C1)
        lhs2 = jnp.stack(halves, axis=1)                      # (B, 2, 32, 9*C1)
        lhs2 = lhs2.reshape(B * H1 * W1, KH * KW * C1).astype(jnp.bfloat16)

        a2 = jnp.dot(lhs2, w2_ref[...], preferred_element_type=jnp.float32)
        a2 = jnp.maximum(a2 + b2_ref[...], 0.0)               # (B*H1*W1, C2)

        # ---------------- maxpool2 ------------------------------------------
        # H-pool: max over the two y-parity halves (contiguous row blocks).
        z = a2.reshape(B, 2, Ho * W1, C2)
        zh = jnp.maximum(z[:, 0], z[:, 1])                    # (B, Ho*W1, C2)
        # W-pool: adjacent-x row pairs via one strided VMEM read pair.
        s3_ref[...] = zh.reshape(B * Ho * W1, C2)
        even = s3_ref[pl.ds(0, B * Ho * Wo, 2), :]
        odd = s3_ref[pl.ds(1, B * Ho * Wo, 2), :]
        out_ref[...] = jnp.maximum(even, odd)                 # (B*Ho*Wo, C2)

    return kernel


@jax.jit
def shallownet_forward(x_nchw, params):
    """ShallowNet forward: NCHW input -> (N, C2*Ho*Wo) flattened features."""
    (w1, b1), (w2, b2) = params
    N, Cin, H, W = x_nchw.shape
    KH, KW = w1.shape[2], w1.shape[3]
    C1, C2 = w1.shape[0], w2.shape[0]
    assert H % 4 == 0 and W % 4 == 0, "spatial dims must be divisible by 4"
    H1, W1 = H // 2, W // 2
    Ho, Wo = H1 // 2, W1 // 2

    B = _pick_batch_block(N)
    n_blocks = -(-N // B)
    N_pad = n_blocks * B

    # ---- conv1 im2col in the wrapper (tiny: N x H*W x 9*Cin) --------------
    K = KH * KW * Cin
    K1 = _round_up(K, 8)
    xh = jnp.transpose(x_nchw, (0, 2, 3, 1))                  # NHWC
    xp = jnp.pad(xh, ((0, 0), (1, 1), (1, 1), (0, 0)))
    cols = [xp[:, kh:kh + H, kw:kw + W, :]
            for kh in range(KH) for kw in range(KW)]
    xcol = jnp.concatenate(cols, axis=-1)                     # (N, H, W, K)
    xcol = jnp.pad(xcol, ((0, N_pad - N), (0, 0), (0, 0), (0, K1 - K)))
    # Reorder rows to (b, hi, wi, ph, pw): the 2x2 pool-1 taps become four
    # contiguous row-quarters inside the kernel.
    xcol = xcol.reshape(N_pad, H1, 2, W1, 2, K1)
    xcol = jnp.transpose(xcol, (0, 2, 4, 1, 3, 5))
    xcol = xcol.reshape(N_pad * H * W, K1).astype(jnp.bfloat16)

    # ---- weights as (kh, kw, cin) x cout matrices, bf16 operands ----------
    w1m = jnp.transpose(w1, (2, 3, 1, 0)).reshape(K, C1)
    w1m = jnp.pad(w1m, ((0, K1 - K), (0, 0))).astype(jnp.bfloat16)
    w2m = jnp.transpose(w2, (2, 3, 1, 0)).reshape(KH * KW * C1, C2)
    w2m = w2m.astype(jnp.bfloat16)
    b1m = b1.reshape(1, C1).astype(jnp.float32)
    b2m = b2.reshape(1, C2).astype(jnp.float32)

    kernel = _make_kernel(B, H, W, K1, C1, C2, KH, KW)

    out = pl.pallas_call(
        kernel,
        out_shape=jax.ShapeDtypeStruct((N_pad * Ho * Wo, C2), jnp.float32),
        grid=(n_blocks,),
        in_specs=[
            pl.BlockSpec((B * H * W, K1), lambda i: (i, 0)),
            pl.BlockSpec((K1, C1), lambda i: (0, 0)),
            pl.BlockSpec((1, C1), lambda i: (0, 0)),
            pl.BlockSpec((KH * KW * C1, C2), lambda i: (0, 0)),
            pl.BlockSpec((1, C2), lambda i: (0, 0)),
        ],
        out_specs=pl.BlockSpec((B * Ho * Wo, C2), lambda i: (i, 0)),
        scratch_shapes=[
            pltpu.VMEM((B, H1 + 2, W1 + 2, C1), jnp.float32),  # padded pooled1
            pltpu.VMEM((B * Ho * W1, C2), jnp.float32),        # pool2 staging
        ],
        compiler_params=pltpu.CompilerParams(
            dimension_semantics=("parallel",)),                # v7x: 2 TCs
    )(xcol, w1m, b1m, w2m, b2m)

    # (N, Ho, Wo, C2) -> NCHW flatten, matching PyTorch's x.view(N, -1).
    out = out.reshape(N_pad, Ho, Wo, C2)[:N]
    return jnp.transpose(out, (0, 3, 1, 2)).reshape(N, -1)


# ----------------------------------------------------------------------------
# Deterministic parameter init (PyTorch Conv2d-style uniform bounds).
# ----------------------------------------------------------------------------
def init_params(key, num_channels=3):
    def conv_init(k, cout, cin, ksz):
        kw_, kb_ = jax.random.split(k)
        fan_in = cin * ksz * ksz
        bound = 1.0 / jnp.sqrt(jnp.float32(fan_in))
        w = jax.random.uniform(kw_, (cout, cin, ksz, ksz), jnp.float32,
                               -bound, bound)
        b = jax.random.uniform(kb_, (cout,), jnp.float32, -bound, bound)
        return w, b

    k1, k2 = jax.random.split(key)
    return [conv_init(k1, 64, num_channels, 3), conv_init(k2, 128, 64, 3)]


# ----------------------------------------------------------------------------
# Pure-JAX reference (XLA conv / reduce_window) for a correctness check.
# ----------------------------------------------------------------------------
def _ref_forward(x_nchw, params):
    (w1, b1), (w2, b2) = params

    def conv(x, w, b):
        y = jax.lax.conv_general_dilated(
            x, w, window_strides=(1, 1), padding="SAME",
            dimension_numbers=("NCHW", "OIHW", "NCHW"))
        return y + b.reshape(1, -1, 1, 1)

    def pool(x):
        return jax.lax.reduce_window(
            x, -jnp.inf, jax.lax.max,
            window_dimensions=(1, 1, 2, 2), window_strides=(1, 1, 2, 2),
            padding="VALID")

    y = pool(jnp.maximum(conv(x_nchw, w1, b1), 0.0))
    y = pool(jnp.maximum(conv(y, w2, b2), 0.0))
    return y.reshape(y.shape[0], -1)


if __name__ == "__main__":
    key = jax.random.PRNGKey(0)
    kx, kp = jax.random.split(key)

    # ShallowNet default: 3 input channels; 16x16 spatial -> (N, 128*4*4).
    x = jax.random.normal(kx, (2, 3, 16, 16), jnp.float32)
    params = init_params(kp, num_channels=3)

    out = jax.block_until_ready(shallownet_forward(x, params))
    assert out.shape == (2, 128 * 4 * 4), out.shape

    ref = jax.block_until_ready(_ref_forward(x, params))
    # bf16 matmul operands with f32 accumulation -> loosened tolerance.
    assert jnp.allclose(out, ref, rtol=2e-2, atol=2e-2), (
        float(jnp.max(jnp.abs(out - ref))))

    print("KERNEL_OK")
</pallas_src>

<mosaic_0001>
module attributes {stable_mosaic.version = 11 : i64} {
  func.func @kernel(%arg0: i32, %arg1: memref<256x32xbf16, #tpu.memory_space<vmem>>, %arg2: memref<32x64xbf16, #tpu.memory_space<vmem>>, %arg3: memref<1x64xf32, #tpu.memory_space<vmem>>, %arg4: memref<576x128xbf16, #tpu.memory_space<vmem>>, %arg5: memref<1x128xf32, #tpu.memory_space<vmem>>, %arg6: memref<16x128xf32, #tpu.memory_space<vmem>>, %arg7: memref<1x10x10x64xf32, #tpu.memory_space<vmem>>, %arg8: memref<32x128xf32, #tpu.memory_space<vmem>>) attributes {dimension_semantics = [#tpu.dimension_semantics<parallel>], iteration_bounds = array<i64: 2>, scalar_prefetch = 0 : i64, scratch_operands = 2 : i64, tpu.core_type = #tpu.core_type<tc>, window_params = [{transform_indices = @transform_0, window_bounds = array<i64: 256, 32>}, {pipeline_mode = #tpu.pipeline_mode<synchronous>, transform_indices = @transform_1, window_bounds = array<i64: 32, 64>}, {pipeline_mode = #tpu.pipeline_mode<synchronous>, transform_indices = @transform_2, window_bounds = array<i64: 1, 64>}, {pipeline_mode = #tpu.pipeline_mode<synchronous>, transform_indices = @transform_3, window_bounds = array<i64: 576, 128>}, {pipeline_mode = #tpu.pipeline_mode<synchronous>, transform_indices = @transform_4, window_bounds = array<i64: 1, 128>}, {transform_indices = @transform_5, window_bounds = array<i64: 16, 128>}]} {
    %c0 = arith.constant 0 : index
    %c0_0 = arith.constant 0 : index
    %0 = vector.load %arg1[%c0, %c0_0] : memref<256x32xbf16, #tpu.memory_space<vmem>>, vector<256x32xbf16>
    %c0_1 = arith.constant 0 : index
    %c0_2 = arith.constant 0 : index
    %1 = vector.load %arg2[%c0_1, %c0_2] : memref<32x64xbf16, #tpu.memory_space<vmem>>, vector<32x64xbf16>
    %cst = arith.constant dense<0.000000e+00> : vector<256x64xf32>
    %2 = tpu.matmul %0, %1, %cst {dimension_numbers = #tpu.dot_dimension_numbers<[1], [0], [0], [1], [0, 0, 1, 1], [], []>} : vector<256x32xbf16>, vector<32x64xbf16>, vector<256x64xf32> -> vector<256x64xf32>
    %c0_3 = arith.constant 0 : index
    %c0_4 = arith.constant 0 : index
    %3 = vector.load %arg3[%c0_3, %c0_4] : memref<1x64xf32, #tpu.memory_space<vmem>>, vector<1x64xf32>
    %4 = vector.broadcast %3 : vector<1x64xf32> to vector<256x64xf32>
    %5 = arith.addf %2, %4 : vector<256x64xf32>
    %cst_5 = arith.constant 0.000000e+00 : f32
    %6 = vector.broadcast %cst_5 : f32 to vector<256x64xf32>
    %7 = arith.maximumf %5, %6 : vector<256x64xf32>
    %8 = vector.shape_cast %7 : vector<256x64xf32> to vector<1x4x64x64xf32>
    %9 = vector.extract_strided_slice %8 {offsets = [0, 0, 0, 0], sizes = [1, 1, 64, 64], strides = [1, 1, 1, 1]} : vector<1x4x64x64xf32> to vector<1x1x64x64xf32>
    %10 = vector.shape_cast %9 : vector<1x1x64x64xf32> to vector<1x64x64xf32>
    %11 = vector.extract_strided_slice %8 {offsets = [0, 1, 0, 0], sizes = [1, 1, 64, 64], strides = [1, 1, 1, 1]} : vector<1x4x64x64xf32> to vector<1x1x64x64xf32>
    %12 = vector.shape_cast %11 : vector<1x1x64x64xf32> to vector<1x64x64xf32>
    %13 = arith.maximumf %10, %12 : vector<1x64x64xf32>
    %14 = vector.extract_strided_slice %8 {offsets = [0, 2, 0, 0], sizes = [1, 1, 64, 64], strides = [1, 1, 1, 1]} : vector<1x4x64x64xf32> to vector<1x1x64x64xf32>
    %15 = vector.shape_cast %14 : vector<1x1x64x64xf32> to vector<1x64x64xf32>
    %16 = vector.extract_strided_slice %8 {offsets = [0, 3, 0, 0], sizes = [1, 1, 64, 64], strides = [1, 1, 1, 1]} : vector<1x4x64x64xf32> to vector<1x1x64x64xf32>
    %17 = vector.shape_cast %16 : vector<1x1x64x64xf32> to vector<1x64x64xf32>
    %18 = arith.maximumf %15, %17 : vector<1x64x64xf32>
    %19 = arith.maximumf %13, %18 : vector<1x64x64xf32>
    %cst_6 = arith.constant 0.000000e+00 : f32
    %20 = vector.broadcast %cst_6 : f32 to vector<1x10x10x64xf32>
    %c0_7 = arith.constant 0 : index
    %c0_8 = arith.constant 0 : index
    %c0_9 = arith.constant 0 : index
    %c0_10 = arith.constant 0 : index
    %21 = vector.load %arg7[%c0_7, %c0_8, %c0_9, %c0_10] : memref<1x10x10x64xf32, #tpu.memory_space<vmem>>, vector<1x10x10x64xf32>
    tpu.vector_store %arg7[%c0_7, %c0_8, %c0_9, %c0_10], %20 {strides = array<i32>} : memref<1x10x10x64xf32, #tpu.memory_space<vmem>>, vector<1x10x10x64xf32>,
    %22 = vector.shape_cast %19 : vector<1x64x64xf32> to vector<1x8x8x64xf32>
    %c0_11 = arith.constant 0 : index
    %c1 = arith.constant 1 : index
    %c1_12 = arith.constant 1 : index
    %c0_13 = arith.constant 0 : index
    %23 = vector.load %arg7[%c0_11, %c1, %c1_12, %c0_13] : memref<1x10x10x64xf32, #tpu.memory_space<vmem>>, vector<1x8x8x64xf32>
    tpu.vector_store %arg7[%c0_11, %c1, %c1_12, %c0_13], %22 {strides = array<i32>} : memref<1x10x10x64xf32, #tpu.memory_space<vmem>>, vector<1x8x8x64xf32>,
    %c0_14 = arith.constant 0 : index
    %c0_15 = arith.constant 0 : index
    %c0_16 = arith.constant 0 : index
    %c0_17 = arith.constant 0 : index
    %24 = tpu.strided_load %arg7[%c0_14, %c0_15, %c0_16, %c0_17] {strides = array<i32: 1, 2, 1, 1>} : memref<1x10x10x64xf32, #tpu.memory_space<vmem>>, vector<1x4x8x64xf32>
    %25 = vector.shape_cast %24 : vector<1x4x8x64xf32> to vector<1x32x64xf32>
    %c0_18 = arith.constant 0 : index
    %c0_19 = arith.constant 0 : index
    %c1_20 = arith.constant 1 : index
    %c0_21 = arith.constant 0 : index
    %26 = tpu.strided_load %arg7[%c0_18, %c0_19, %c1_20, %c0_21] {strides = array<i32: 1, 2, 1, 1>} : memref<1x10x10x64xf32, #tpu.memory_space<vmem>>, vector<1x4x8x64xf32>
    %27 = vector.shape_cast %26 : vector<1x4x8x64xf32> to vector<1x32x64xf32>
    %c0_22 = arith.constant 0 : index
    %c0_23 = arith.constant 0 : index
    %c2 = arith.constant 2 : index
    %c0_24 = arith.constant 0 : index
    %28 = tpu.strided_load %arg7[%c0_22, %c0_23, %c2, %c0_24] {strides = array<i32: 1, 2, 1, 1>} : memref<1x10x10x64xf32, #tpu.memory_space<vmem>>, vector<1x4x8x64xf32>
    %29 = vector.shape_cast %28 : vector<1x4x8x64xf32> to vector<1x32x64xf32>
    %c0_25 = arith.constant 0 : index
    %c1_26 = arith.constant 1 : index
    %c0_27 = arith.constant 0 : index
    %c0_28 = arith.constant 0 : index
    %30 = tpu.strided_load %arg7[%c0_25, %c1_26, %c0_27, %c0_28] {strides = array<i32: 1, 2, 1, 1>} : memref<1x10x10x64xf32, #tpu.memory_space<vmem>>, vector<1x4x8x64xf32>
    %31 = vector.shape_cast %30 : vector<1x4x8x64xf32> to vector<1x32x64xf32>
    %c0_29 = arith.constant 0 : index
    %c1_30 = arith.constant 1 : index
    %c1_31 = arith.constant 1 : index
    %c0_32 = arith.constant 0 : index
    %32 = tpu.strided_load %arg7[%c0_29, %c1_30, %c1_31, %c0_32] {strides = array<i32: 1, 2, 1, 1>} : memref<1x10x10x64xf32, #tpu.memory_space<vmem>>, vector<1x4x8x64xf32>
    %33 = vector.shape_cast %32 : vector<1x4x8x64xf32> to vector<1x32x64xf32>
    %c0_33 = arith.constant 0 : index
    %c1_34 = arith.constant 1 : index
    %c2_35 = arith.constant 2 : index
    %c0_36 = arith.constant 0 : index
    %34 = tpu.strided_load %arg7[%c0_33, %c1_34, %c2_35, %c0_36] {strides = array<i32: 1, 2, 1, 1>} : memref<1x10x10x64xf32, #tpu.memory_space<vmem>>, vector<1x4x8x64xf32>
    %35 = vector.shape_cast %34 : vector<1x4x8x64xf32> to vector<1x32x64xf32>
    %c0_37 = arith.constant 0 : index
    %c2_38 = arith.constant 2 : index
    %c0_39 = arith.constant 0 : index
    %c0_40 = arith.constant 0 : index
    %36 = tpu.strided_load %arg7[%c0_37, %c2_38, %c0_39, %c0_40] {strides = array<i32: 1, 2, 1, 1>} : memref<1x10x10x64xf32, #tpu.memory_space<vmem>>, vector<1x4x8x64xf32>
    %37 = vector.shape_cast %36 : vector<1x4x8x64xf32> to vector<1x32x64xf32>
    %c0_41 = arith.constant 0 : index
    %c2_42 = arith.constant 2 : index
    %c1_43 = arith.constant 1 : index
    %c0_44 = arith.constant 0 : index
    %38 = tpu.strided_load %arg7[%c0_41, %c2_42, %c1_43, %c0_44] {strides = array<i32: 1, 2, 1, 1>} : memref<1x10x10x64xf32, #tpu.memory_space<vmem>>, vector<1x4x8x64xf32>
    %39 = vector.shape_cast %38 : vector<1x4x8x64xf32> to vector<1x32x64xf32>
    %c0_45 = arith.constant 0 : index
    %c2_46 = arith.constant 2 : index
    %c2_47 = arith.constant 2 : index
    %c0_48 = arith.constant 0 : index
    %40 = tpu.strided_load %arg7[%c0_45, %c2_46, %c2_47, %c0_48] {strides = array<i32: 1, 2, 1, 1>} : memref<1x10x10x64xf32, #tpu.memory_space<vmem>>, vector<1x4x8x64xf32>
    %41 = vector.shape_cast %40 : vector<1x4x8x64xf32> to vector<1x32x64xf32>
    %42 = tpu.concatenate %25, %27, %29, %31, %33, %35, %37, %39, %41 in 2 : vector<1x32x64xf32>, vector<1x32x64xf32>, vector<1x32x64xf32>, vector<1x32x64xf32>, vector<1x32x64xf32>, vector<1x32x64xf32>, vector<1x32x64xf32>, vector<1x32x64xf32>, vector<1x32x64xf32> -> vector<1x32x576xf32>
    %c0_49 = arith.constant 0 : index
    %c1_50 = arith.constant 1 : index
    %c0_51 = arith.constant 0 : index
    %c0_52 = arith.constant 0 : index
    %43 = tpu.strided_load %arg7[%c0_49, %c1_50, %c0_51, %c0_52] {strides = array<i32: 1, 2, 1, 1>} : memref<1x10x10x64xf32, #tpu.memory_space<vmem>>, vector<1x4x8x64xf32>
    %44 = vector.shape_cast %43 : vector<1x4x8x64xf32> to vector<1x32x64xf32>
    %c0_53 = arith.constant 0 : index
    %c1_54 = arith.constant 1 : index
    %c1_55 = arith.constant 1 : index
    %c0_56 = arith.constant 0 : index
    %45 = tpu.strided_load %arg7[%c0_53, %c1_54, %c1_55, %c0_56] {strides = array<i32: 1, 2, 1, 1>} : memref<1x10x10x64xf32, #tpu.memory_space<vmem>>, vector<1x4x8x64xf32>
    %46 = vector.shape_cast %45 : vector<1x4x8x64xf32> to vector<1x32x64xf32>
    %c0_57 = arith.constant 0 : index
    %c1_58 = arith.constant 1 : index
    %c2_59 = arith.constant 2 : index
    %c0_60 = arith.constant 0 : index
    %47 = tpu.strided_load %arg7[%c0_57, %c1_58, %c2_59, %c0_60] {strides = array<i32: 1, 2, 1, 1>} : memref<1x10x10x64xf32, #tpu.memory_space<vmem>>, vector<1x4x8x64xf32>
    %48 = vector.shape_cast %47 : vector<1x4x8x64xf32> to vector<1x32x64xf32>
    %c0_61 = arith.constant 0 : index
    %c2_62 = arith.constant 2 : index
    %c0_63 = arith.constant 0 : index
    %c0_64 = arith.constant 0 : index
    %49 = tpu.strided_load %arg7[%c0_61, %c2_62, %c0_63, %c0_64] {strides = array<i32: 1, 2, 1, 1>} : memref<1x10x10x64xf32, #tpu.memory_space<vmem>>, vector<1x4x8x64xf32>
    %50 = vector.shape_cast %49 : vector<1x4x8x64xf32> to vector<1x32x64xf32>
    %c0_65 = arith.constant 0 : index
    %c2_66 = arith.constant 2 : index
    %c1_67 = arith.constant 1 : index
    %c0_68 = arith.constant 0 : index
    %51 = tpu.strided_load %arg7[%c0_65, %c2_66, %c1_67, %c0_68] {strides = array<i32: 1, 2, 1, 1>} : memref<1x10x10x64xf32, #tpu.memory_space<vmem>>, vector<1x4x8x64xf32>
    %52 = vector.shape_cast %51 : vector<1x4x8x64xf32> to vector<1x32x64xf32>
    %c0_69 = arith.constant 0 : index
    %c2_70 = arith.constant 2 : index
    %c2_71 = arith.constant 2 : index
    %c0_72 = arith.constant 0 : index
    %53 = tpu.strided_load %arg7[%c0_69, %c2_70, %c2_71, %c0_72] {strides = array<i32: 1, 2, 1, 1>} : memref<1x10x10x64xf32, #tpu.memory_space<vmem>>, vector<1x4x8x64xf32>
    %54 = vector.shape_cast %53 : vector<1x4x8x64xf32> to vector<1x32x64xf32>
    %c0_73 = arith.constant 0 : index
    %c3 = arith.constant 3 : index
    %c0_74 = arith.constant 0 : index
    %c0_75 = arith.constant 0 : index
    %55 = tpu.strided_load %arg7[%c0_73, %c3, %c0_74, %c0_75] {strides = array<i32: 1, 2, 1, 1>} : memref<1x10x10x64xf32, #tpu.memory_space<vmem>>, vector<1x4x8x64xf32>
    %56 = vector.shape_cast %55 : vector<1x4x8x64xf32> to vector<1x32x64xf32>
    %c0_76 = arith.constant 0 : index
    %c3_77 = arith.constant 3 : index
    %c1_78 = arith.constant 1 : index
    %c0_79 = arith.constant 0 : index
    %57 = tpu.strided_load %arg7[%c0_76, %c3_77, %c1_78, %c0_79] {strides = array<i32: 1, 2, 1, 1>} : memref<1x10x10x64xf32, #tpu.memory_space<vmem>>, vector<1x4x8x64xf32>
    %58 = vector.shape_cast %57 : vector<1x4x8x64xf32> to vector<1x32x64xf32>
    %c0_80 = arith.constant 0 : index
    %c3_81 = arith.constant 3 : index
    %c2_82 = arith.constant 2 : index
    %c0_83 = arith.constant 0 : index
    %59 = tpu.strided_load %arg7[%c0_80, %c3_81, %c2_82, %c0_83] {strides = array<i32: 1, 2, 1, 1>} : memref<1x10x10x64xf32, #tpu.memory_space<vmem>>, vector<1x4x8x64xf32>
    %60 = vector.shape_cast %59 : vector<1x4x8x64xf32> to vector<1x32x64xf32>
    %61 = tpu.concatenate %44, %46, %48, %50, %52, %54, %56, %58, %60 in 2 : vector<1x32x64xf32>, vector<1x32x64xf32>, vector<1x32x64xf32>, vector<1x32x64xf32>, vector<1x32x64xf32>, vector<1x32x64xf32>, vector<1x32x64xf32>, vector<1x32x64xf32>, vector<1x32x64xf32> -> vector<1x32x576xf32>
    %62 = vector.shape_cast %42 : vector<1x32x576xf32> to vector<1x1x32x576xf32>
    %63 = vector.shape_cast %61 : vector<1x32x576xf32> to vector<1x1x32x576xf32>
    %64 = tpu.concatenate %62, %63 in 1 : vector<1x1x32x576xf32>, vector<1x1x32x576xf32> -> vector<1x2x32x576xf32>
    %65 = vector.shape_cast %64 : vector<1x2x32x576xf32> to vector<64x576xf32>
    %66 = arith.truncf %65 : vector<64x576xf32> to vector<64x576xbf16>
    %c0_84 = arith.constant 0 : index
    %c0_85 = arith.constant 0 : index
    %67 = vector.load %arg4[%c0_84, %c0_85] : memref<576x128xbf16, #tpu.memory_space<vmem>>, vector<576x128xbf16>
    %cst_86 = arith.constant dense<0.000000e+00> : vector<64x128xf32>
    %68 = tpu.matmul %66, %67, %cst_86 {dimension_numbers = #tpu.dot_dimension_numbers<[1], [0], [0], [1], [0, 0, 1, 1], [], []>} : vector<64x576xbf16>, vector<576x128xbf16>, vector<64x128xf32> -> vector<64x128xf32>
    %c0_87 = arith.constant 0 : index
    %c0_88 = arith.constant 0 : index
    %69 = vector.load %arg5[%c0_87, %c0_88] : memref<1x128xf32, #tpu.memory_space<vmem>>, vector<1x128xf32>
    %70 = vector.broadcast %69 : vector<1x128xf32> to vector<64x128xf32>
    %71 = arith.addf %68, %70 : vector<64x128xf32>
    %cst_89 = arith.constant 0.000000e+00 : f32
    %72 = vector.broadcast %cst_89 : f32 to vector<64x128xf32>
    %73 = arith.maximumf %71, %72 : vector<64x128xf32>
    %74 = vector.shape_cast %73 : vector<64x128xf32> to vector<1x2x32x128xf32>
    %75 = vector.extract_strided_slice %74 {offsets = [0, 0, 0, 0], sizes = [1, 1, 32, 128], strides = [1, 1, 1, 1]} : vector<1x2x32x128xf32> to vector<1x1x32x128xf32>
    %76 = vector.shape_cast %75 : vector<1x1x32x128xf32> to vector<1x32x128xf32>
    %77 = vector.extract_strided_slice %74 {offsets = [0, 1, 0, 0], sizes = [1, 1, 32, 128], strides = [1, 1, 1, 1]} : vector<1x2x32x128xf32> to vector<1x1x32x128xf32>
    %78 = vector.shape_cast %77 : vector<1x1x32x128xf32> to vector<1x32x128xf32>
    %79 = arith.maximumf %76, %78 : vector<1x32x128xf32>
    %80 = vector.shape_cast %79 : vector<1x32x128xf32> to vector<32x128xf32>
    %c0_90 = arith.constant 0 : index
    %c0_91 = arith.constant 0 : index
    %81 = vector.load %arg8[%c0_90, %c0_91] : memref<32x128xf32, #tpu.memory_space<vmem>>, vector<32x128xf32>
    tpu.vector_store %arg8[%c0_90, %c0_91], %80 {strides = array<i32>} : memref<32x128xf32, #tpu.memory_space<vmem>>, vector<32x128xf32>,
    %c0_92 = arith.constant 0 : index
    %c0_93 = arith.constant 0 : index
    %82 = tpu.strided_load %arg8[%c0_92, %c0_93] {strides = array<i32: 2, 1>} : memref<32x128xf32, #tpu.memory_space<vmem>>, vector<16x128xf32>
    %c1_94 = arith.constant 1 : index
    %c0_95 = arith.constant 0 : index
    %83 = tpu.strided_load %arg8[%c1_94, %c0_95] {strides = array<i32: 2, 1>} : memref<32x128xf32, #tpu.memory_space<vmem>>, vector<16x128xf32>
    %84 = arith.maximumf %82, %83 : vector<16x128xf32>
    %c0_96 = arith.constant 0 : index
    %c0_97 = arith.constant 0 : index
    %85 = vector.load %arg6[%c0_96, %c0_97] : memref<16x128xf32, #tpu.memory_space<vmem>>, vector<16x128xf32>
    tpu.vector_store %arg6[%c0_96, %c0_97], %84 {strides = array<i32>} : memref<16x128xf32, #tpu.memory_space<vmem>>, vector<16x128xf32>,
    return
  }
  func.func @transform_0(%arg0: i32) -> (i32, i32) {
    %c0_i32 = arith.constant 0 : i32
    %c0_i32_0 = arith.constant 0 : i32
    return %arg0, %c0_i32 : i32, i32
  }
  func.func @transform_1(%arg0: i32) -> (i32, i32) {
    %c0_i32 = arith.constant 0 : i32
    %c0_i32_0 = arith.constant 0 : i32
    %c0_i32_1 = arith.constant 0 : i32
    return %c0_i32, %c0_i32_0 : i32, i32
  }
  func.func @transform_2(%arg0: i32) -> (i32, i32) {
    %c0_i32 = arith.constant 0 : i32
    %c0_i32_0 = arith.constant 0 : i32
    %c0_i32_1 = arith.constant 0 : i32
    return %c0_i32, %c0_i32_0 : i32, i32
  }
  func.func @transform_3(%arg0: i32) -> (i32, i32) {
    %c0_i32 = arith.constant 0 : i32
    %c0_i32_0 = arith.constant 0 : i32
    %c0_i32_1 = arith.constant 0 : i32
    return %c0_i32, %c0_i32_0 : i32, i32
  }
  func.func @transform_4(%arg0: i32) -> (i32, i32) {
    %c0_i32 = arith.constant 0 : i32
    %c0_i32_0 = arith.constant 0 : i32
    %c0_i32_1 = arith.constant 0 : i32
    return %c0_i32, %c0_i32_0 : i32, i32
  }
  func.func @transform_5(%arg0: i32) -> (i32, i32) {
    %c0_i32 = arith.constant 0 : i32
    %c0_i32_0 = arith.constant 0 : i32
    return %arg0, %c0_i32 : i32, i32
  }
}

</mosaic_0001>

<bundles_post_ra>
// kernel: shallownet_forward.1
= control target key start
LH: loop header
LB: loop body
LE: loop exit
PB: predicated region body
PF: predicated region fallthrough
CT: control target
= control target key end

     0   :  { %s1905_s18 = smov 0   ;;  %s2333_s0 = inlined_call_operand.vmem [shape: bf16[512,32], index: 0, kind: input, shape index: {}]   ;;  %s2334_s1 = inlined_call_operand.vmem [shape: bf16[32,64], index: 1, kind: input, shape index: {}]   ;;  %s2335_s2 = inlined_call_operand.vmem [shape: f32[1,64], index: 2, kind: input, shape index: {}]   ;;  %s2336_s3 = inlined_call_operand.vmem [shape: bf16[576,128], index: 3, kind: input, shape index: {}]   ;;  %s2337_s4 = inlined_call_operand.vmem [shape: f32[1,128], index: 4, kind: input, shape index: {}]   ;;  %s2338_s5 = inlined_call_operand.vmem [shape: f32[32,128], index: 5, kind: output, shape index: {}]  }
   0x1 LB: > { %s1476_s19 = sadd.s32 4294967295, %s1871_s18   ;;  %p1480_p0 = scmp.ge.s32.totalorder %s1871_s18, 1  ;;  %s1871_s18 = sphi %s1905_s18, %s15_s18  }
   0x2   : > { %p188_p1 = scmp.lt.s32.totalorder %s1871_s18, 3 }
   0x4   : > { %p189_p2 = pnand %p1480_p0, %p188_p1 }
   0x5   : > { %v1811_v0 = vld [vmem:[%s2334_s1] sm:$0xff] (!%p189_p2)   ;;  %s1481_s22 = sshll.u32 (!%p189_p2), %s1476_s19, 5  ;;  %v1812_v1 = vld [vmem:[%s2334_s1 + $0x8] sm:$0xff] (!%p189_p2)   ;;  %vm364_vm0 = vcmask (!%p189_p2), 261120   ;;  %vm630_vm1 = vcmask (!%p189_p2), 523264   ;;  %vm632_vm2 = vcmask (!%p189_p2), 517120  }
   0x6   : > { %192 = sbr.rel (%p189_p2) target bundleno = 713 (0x2c9), region = 40  ;;  %p217_p3 = scmp.lt.s32.totalorder (!%p189_p2), %s1481_s22, 63  ;;  %1669 = vmatprep.subr.bf16.mxu0 (!%p189_p2), %v1811_v0  ;;  %v1873_v18 = vmov (!%p189_p2), 0.0   ;;  %v1829_v19 = vld [vmem:[%s2336_s3 + $0x100] sm:$0xff] (!%p189_p2)   ;;  %v1830_v20 = vld [vmem:[%s2336_s3 + $0x108] sm:$0xff] (!%p189_p2)   ;;  %v1831_v21 = vld [vmem:[%s2336_s3 + $0x110] sm:$0xff] (!%p189_p2)  }
   0x7   : > { %1670 = vmatpush3.bf16.msra.mxu0 (!%p189_p2), %v1811_v0  ;;  %638 = vst.msk [vmem:[#allocation2 + $0x30] sm:$0xff] (!%p189_p2), %vm630_vm1, %v1873_v18  ;;  %631 = vst.msk [vmem:[#allocation2] sm:$0xff] (!%p189_p2), %vm630_vm1, %v1873_v18  ;;  %v1832_v22 = vld [vmem:[%s2336_s3 + $0x118] sm:$0xff] (!%p189_p2)   ;;  %v1833_v23 = vld [vmem:[%s2336_s3 + $0x40] sm:$0xff] (!%p189_p2)   ;;  %s1874_s27 = smov (!%p189_p2), 64   ;;  %s1483_s12 = sshll.u32 (!%p189_p2), %s1476_s19, 1 }
   0x8   : > { %1671 = vmatprep.subr.bf16.mxu0 (!%p189_p2), %v1812_v1  ;;  %639 = vst.msk [vmem:[#allocation2 + $0x38] sm:$0x3] (!%p189_p2), %vm632_vm2, %v1873_v18  ;;  %633 = vst.msk [vmem:[#allocation2 + $0x8] sm:$0x3] (!%p189_p2), %vm632_vm2, %v1873_v18  ;;  %v1834_v24 = vld [vmem:[%s2336_s3] sm:$0xff] (!%p189_p2)   ;;  %v1835_v25 = vld [vmem:[%s2336_s3 + $0x48] sm:$0xff] (!%p189_p2)   ;;  %1581 = vmatprep.subr.bf16.mxu1 (!%p189_p2), %v1833_v23 }
   0x9   : > { %634 = vst.msk [vmem:[#allocation2 + $0x10] sm:$0xff] (!%p189_p2), %vm630_vm1, %v1873_v18  ;;  %636 = vst.msk [vmem:[#allocation2 + $0x20] sm:$0xff] (!%p189_p2), %vm630_vm1, %v1873_v18  ;;  %1582 = vmatpush3.bf16.msra.mxu1 (!%p189_p2), %v1834_v24  ;;  %v1836_v26 = vld [vmem:[%s2336_s3 + $0x8] sm:$0xff] (!%p189_p2)   ;;  %v1837_v27 = vld [vmem:[%s2336_s3 + $0x50] sm:$0xff] (!%p189_p2)   ;;  %p223_p4 = scmp.lt.s32.totalorder (!%p189_p2), %s1483_s12, 3 }
   0xa   : > { %635 = vst.msk [vmem:[#allocation2 + $0x18] sm:$0x3] (!%p189_p2), %vm632_vm2, %v1873_v18  ;;  %637 = vst.msk [vmem:[#allocation2 + $0x28] sm:$0x3] (!%p189_p2), %vm632_vm2, %v1873_v18  ;;  %1583 = vmatprep.subr.bf16.mxu1 (!%p189_p2), %v1835_v25  ;;  %v1838_v28 = vld [vmem:[%s2336_s3 + $0x10] sm:$0xff] (!%p189_p2)   ;;  %v1839_v29 = vld [vmem:[%s2336_s3 + $0x58] sm:$0xff] (!%p189_p2)  }
   0xb   : > { %1672 = vmatpush3.bf16.msra.mxu0 (!%p189_p2), %v1812_v1  ;;  %640 = vst.msk [vmem:[#allocation2 + $0x40] sm:$0xff] (!%p189_p2), %vm630_vm1, %v1873_v18  ;;  %642 = vst.msk [vmem:[#allocation2 + $0x50] sm:$0xff] (!%p189_p2), %vm630_vm1, %v1873_v18  ;;  %v1840_v30 = vld [vmem:[%s2336_s3 + $0x18] sm:$0xff] (!%p189_p2)   ;;  %v1841_v31 = vld [vmem:[%s2336_s3 + $0x60] sm:$0xff] (!%p189_p2)  }
   0xc   : > { %641 = vst.msk [vmem:[#allocation2 + $0x48] sm:$0x3] (!%p189_p2), %vm632_vm2, %v1873_v18  ;;  %643 = vst.msk [vmem:[#allocation2 + $0x58] sm:$0x3] (!%p189_p2), %vm632_vm2, %v1873_v18  ;;  %1705 = vmatprep.subr.bf16.mxu0 (!%p189_p2), %v1829_v19  ;;  %v1842_v32 = vld [vmem:[%s2336_s3 + $0x20] sm:$0xff] (!%p189_p2)   ;;  %v1843_v33 = vld [vmem:[%s2336_s3 + $0x68] sm:$0xff] (!%p189_p2)  }
   0xd   : > { %s2340_s22 = smov (!%p217_p3, %s1481_s22), 63  ;;  %644 = vst.msk [vmem:[#allocation2 + $0x60] sm:$0xff] %vm630_vm1, %v1873_v18  ;;  %646 = vst.msk [vmem:[#allocation2 + $0x70] sm:$0xff] %vm630_vm1, %v1873_v18  ;;  %1584 = vmatpush3.bf16.msra.mxu1 %v1836_v26  ;;  %v1844_v34 = vld [vmem:[%s2336_s3 + $0x28] sm:$0xff]   ;;  %v2029_v43 = vld [vmem:[%s2335_s2] ss:$0 sm:$0xff] }
   0xe   : > { %s1482_s25 = sshll.u32 %s2340_s22, 2  ;;  %645 = vst.msk [vmem:[#allocation2 + $0x68] sm:$0x3] %vm632_vm2, %v1873_v18  ;;  %647 = vst.msk [vmem:[#allocation2 + $0x78] sm:$0x3] %vm632_vm2, %v1873_v18  ;;  %1585 = vmatprep.subr.bf16.mxu1 %v1837_v27  ;;  %s2342_s12 = smov (!%p223_p4, %s1483_s12), 3 }
   0xf   : > { %s1924_s28 = scalar_lea.vmem %s2333_s0, %s1482_s25  ;;  %648 = vst.msk [vmem:[#allocation2 + $0x80] sm:$0xff] %vm630_vm1, %v1873_v18  ;;  %650 = vst.msk [vmem:[#allocation2 + $0x90] sm:$0xff] %vm630_vm1, %v1873_v18  ;;  %s1484_s19 = sshll.u32 %s2342_s12, 3 }
  0x10   : > { %v1813_v2 = vld [vmem:[%s1924_s28] sm:$0xff]   ;;  %v1814_v3 = vld [vmem:[%s1924_s28 + $0x8] sm:$0xff]   ;;  %v1815_v4 = vld [vmem:[%s1924_s28 + $0x10] sm:$0xff]   ;;  %649 = vst.msk [vmem:[#allocation2 + $0x88] sm:$0x3] %vm632_vm2, %v1873_v18  ;;  %s226_s15 = scalar_lea.vmem %s2338_s5, %s1484_s19 }
  0x11   : > { %1673 = vmatprep.mubr.msk.bf16.mxu0 %vm364_vm0, %v1813_v2  ;;  %v1816_v5 = vld [vmem:[%s1924_s28 + $0x18] sm:$0xff]   ;;  %v1817_v6 = vld [vmem:[%s1924_s28 + $0x20] sm:$0xff]   ;;  %v1818_v7 = vld [vmem:[%s1924_s28 + $0x28] sm:$0xff]   ;;  %651 = vst.msk [vmem:[#allocation2 + $0x98] sm:$0x3] %vm632_vm2, %v1873_v18  ;;  %1586 = vmatpush3.bf16.msra.mxu1 %v1838_v28 }
  0x12   : > { %1674 = vmatmul.mubr.msk.bf16.vlgmr.msra.gmra.mrb[0].mxu0 %vm364_vm0, %v1814_v3  ;;  %v1819_v8 = vld [vmem:[%s1924_s28 + $0x30] sm:$0xff]   ;;  %v1820_v9 = vld [vmem:[%s1924_s28 + $0x38] sm:$0xff]   ;;  %v1821_v10 = vld [vmem:[%s1924_s28 + $0x40] sm:$0xff]   ;;  %1587 = vmatprep.subr.bf16.mxu1 %v1839_v29 }
  0x13   : > { %1677 = vmatprep.mubr.msk.bf16.mxu0 %vm364_vm0, %v1815_v4  ;;  %v1822_v11 = vld [vmem:[%s1924_s28 + $0x48] sm:$0xff]   ;;  %v1823_v12 = vld [vmem:[%s1924_s28 + $0x50] sm:$0xff]   ;;  %v1824_v13 = vld [vmem:[%s1924_s28 + $0x58] sm:$0xff]   ;;  %1706 = vmatpush3.bf16.msra.mxu0 %v1829_v19 }
  0x14   : > { %v1825_v14 = vld [vmem:[%s1924_s28 + $0x60] sm:$0xff]   ;;  %v1826_v15 = vld [vmem:[%s1924_s28 + $0x68] sm:$0xff]   ;;  %v1827_v16 = vld [vmem:[%s1924_s28 + $0x70] sm:$0xff]   ;;  %1707 = vmatprep.subr.bf16.mxu0 %v1830_v20 }
  0x15   : > { %v1828_v17 = vld [vmem:[%s1924_s28 + $0x78] sm:$0xff]   ;;  %1588 = vmatpush3.bf16.msra.mxu1 %v1840_v30 }
  0x16   : > { %1589 = vmatprep.subr.bf16.mxu1 %v1841_v31 }
  0x17   : > { %1708 = vmatpush3.bf16.msra.mxu0 %v1830_v20 }
  0x18   : > { %1709 = vmatprep.subr.bf16.mxu0 %v1831_v21 }
  0x19   : > { %1590 = vmatpush3.bf16.msra.mxu1 %v1842_v32 }
  0x1a   : > { %1678 = vmatmul.mubr.msk.bf16.gmra.mrb[4].mxu0 %vm364_vm0, %v1816_v5  ;;  %1591 = vmatprep.subr.bf16.mxu1 %v1843_v33 }
  0x1b   : > { %1681 = vmatprep.mubr.msk.bf16.mxu0 %vm364_vm0, %v1817_v6  ;;  %1710 = vmatpush3.bf16.msra.mxu0 %v1831_v21 }
  0x1c   : > { %1711 = vmatprep.subr.bf16.mxu0 %v1832_v22 }
  0x1d   : > { %1592 = vmatpush3.bf16.msra.mxu1 %v1844_v34 }
  0x1f   : > { %1712 = vmatpush3.bf16.msra.mxu0 %v1832_v22 }
  0x22   : > { %1682 = vmatmul.mubr.msk.bf16.gmra.mrb[8].mxu0 %vm364_vm0, %v1818_v7 }
  0x23   : > { %1685 = vmatprep.mubr.msk.bf16.mxu0 %vm364_vm0, %v1819_v8 }
  0x2a   : > { %1686 = vmatmul.mubr.msk.bf16.gmra.mrb[12].mxu0 %vm364_vm0, %v1820_v9 }
  0x2b   : > { %1689 = vmatprep.mubr.msk.bf16.mxu0 %vm364_vm0, %v1821_v10 }
  0x32   : > { %1690 = vmatmul.mubr.msk.bf16.gmra.mrb[16].mxu0 %vm364_vm0, %v1822_v11 }
  0x33   : > { %1693 = vmatprep.mubr.msk.bf16.mxu0 %vm364_vm0, %v1823_v12 }
  0x3a   : > { %1694 = vmatmul.mubr.msk.bf16.gmra.mrb[20].mxu0 %vm364_vm0, %v1824_v13 }
  0x3b   : > { %1697 = vmatprep.mubr.msk.bf16.mxu0 %vm364_vm0, %v1825_v14 }
  0x42   : > { %1698 = vmatmul.mubr.msk.bf16.gmra.mrb[24].mxu0 %vm364_vm0, %v1826_v15 }
  0x43   : > { %1701 = vmatprep.mubr.msk.bf16.mxu0 %vm364_vm0, %v1827_v16 }
  0x4a   : > { %1702 = vmatmul.mubr.msk.bf16.gmra.mrb[28].mxu0 %vm364_vm0, %v1828_v17 }
  0xe5   : > { %v1675_v35 = vpop.f32.mrb[0].mxu0 }
  0xe6   : > { %v447_v36 = vpop.f32.mrb[1].mxu0  ;;  %v456_v44 = vadd.f32 %v1675_v35, %v2029_v43 }
  0xe7   : > { %v1676_v37 = vpop.f32.mrb[2].mxu0  ;;  %v448_v45 = vadd.f32 %v2029_v43, %v447_v36 }
  0xe8   : > { %v450_v38 = vpop.f32.mrb[3].mxu0  ;;  %v459_v47 = vadd.f32 %v1676_v37, %v2029_v43  ;;  %v576_v53 = vmax.f32 %v456_v44, 0.0 }
  0xe9   : > { %v451_v50 = vadd.f32 %v2029_v43, %v450_v38  ;;  %v574_v57 = vmax.f32 %v448_v45, 0.0 }
  0xea   : > { %v577_v60 = vmax.f32 %v459_v47, 0.0 }
  0xeb   : > { %v575_v63 = vmax.f32 %v451_v50, 0.0 }
  0xed   : > { %v1679_v39 = vpop.f32.mrb[4].mxu0 }
  0xee   : > { %v463_v40 = vpop.f32.mrb[5].mxu0  ;;  %v472_v2 = vadd.f32 %v1679_v39, %v2029_v43 }
  0xef   : > { %v1680_v41 = vpop.f32.mrb[6].mxu0  ;;  %v464_v4 = vadd.f32 %v2029_v43, %v463_v40 }
  0xf0   : > { %v466_v42 = vpop.f32.mrb[7].mxu0  ;;  %v475_v7 = vadd.f32 %v1680_v41, %v2029_v43  ;;  %v580_v13 = vmax.f32 %v472_v2, 0.0 }
  0xf1   : > { %v467_v10 = vadd.f32 %v2029_v43, %v466_v42  ;;  %v578_v17 = vmax.f32 %v464_v4, 0.0 }
  0xf2   : > { %v581_v20 = vmax.f32 %v475_v7, 0.0 }
  0xf3   : > { %v579_v23 = vmax.f32 %v467_v10, 0.0 }
  0xf5   : > { %v1683_v46 = vpop.f32.mrb[8].mxu0 }
  0xf6   : > { %v488_v48 = vadd.f32 %v1683_v46, %v2029_v43  ;;  %v479_v49 = vpop.f32.mrb[9].mxu0 }
  0xf7   : > { %v480_v51 = vadd.f32 %v2029_v43, %v479_v49  ;;  %v1684_v52 = vpop.f32.mrb[10].mxu0 }
  0xf8   : > { %v584_v54 = vmax.f32 %v488_v48, 0.0  ;;  %v491_v55 = vadd.f32 %v1684_v52, %v2029_v43  ;;  %v482_v56 = vpop.f32.mrb[11].mxu0 }
  0xf9   : > { %v582_v58 = vmax.f32 %v480_v51, 0.0  ;;  %v483_v59 = vadd.f32 %v2029_v43, %v482_v56 }
  0xfa   : > { %v2039_v61 = vmax.f32 %v576_v53, %v584_v54  ;;  %v585_v62 = vmax.f32 %v491_v55, 0.0 }
  0xfb   : > { %v2041_v0 = vmax.f32 %v574_v57, %v582_v58  ;;  %v583_v1 = vmax.f32 %v483_v59, 0.0 }
  0xfc   : > { %v2044_v3 = vmax.f32 %v577_v60, %v585_v62 }
  0xfd   : > { %v2047_v5 = vmax.f32 %v575_v63, %v583_v1  ;;  %v1687_v6 = vpop.f32.mrb[12].mxu0  ;;  %v1845_v63 = vld [vmem:[%s2336_s3 + $0x70] sm:$0xff]  }
  0xfe   : > { %v504_v8 = vadd.f32 %v1687_v6, %v2029_v43  ;;  %v495_v9 = vpop.f32.mrb[13].mxu0  ;;  %v1846_v1 = vld [vmem:[%s2336_s3 + $0x30] sm:$0xff]   ;;  %1593 = vmatprep.subr.bf16.mxu1 %v1845_v63 }
  0xff   : > { %v496_v11 = vadd.f32 %v2029_v43, %v495_v9  ;;  %v1688_v12 = vpop.f32.mrb[14].mxu0  ;;  %1594 = vmatpush3.bf16.msra.mxu1 %v1846_v1 }
 0x100   : > { %v588_v14 = vmax.f32 %v504_v8, 0.0  ;;  %v507_v15 = vadd.f32 %v1688_v12, %v2029_v43  ;;  %v498_v16 = vpop.f32.mrb[15].mxu0 }
 0x101   : > { %v586_v18 = vmax.f32 %v496_v11, 0.0  ;;  %v499_v19 = vadd.f32 %v2029_v43, %v498_v16 }
 0x102   : > { %v2055_v21 = vmax.f32 %v580_v13, %v588_v14  ;;  %v589_v22 = vmax.f32 %v507_v15, 0.0 }
 0x103   : > { %v2057_v24 = vmax.f32 %v578_v17, %v586_v18  ;;  %v587_v25 = vmax.f32 %v499_v19, 0.0  ;;  %v1847_v17 = vld [vmem:[%s2336_s3 + $0x78] sm:$0xff]  }
 0x104   : > { %v2059_v26 = vmax.f32 %v581_v20, %v589_v22  ;;  %v1848_v18 = vld [vmem:[%s2336_s3 + $0x38] sm:$0xff]   ;;  %1595 = vmatprep.subr.bf16.mxu1 %v1847_v17 }
 0x105   : > { %v2061_v27 = vmax.f32 %v579_v23, %v587_v25  ;;  %v1691_v28 = vpop.f32.mrb[16].mxu0  ;;  %1596 = vmatpush3.bf16.msra.mxu1 %v1848_v18 }
 0x106   : > { %v511_v29 = vpop.f32.mrb[17].mxu0  ;;  %v520_v36 = vadd.f32 %v1691_v28, %v2029_v43 }
 0x107   : > { %v1692_v30 = vpop.f32.mrb[18].mxu0  ;;  %v512_v37 = vadd.f32 %v2029_v43, %v511_v29 }
 0x108   : > { %v514_v31 = vpop.f32.mrb[19].mxu0  ;;  %v523_v39 = vadd.f32 %v1692_v30, %v2029_v43  ;;  %v592_v46 = vmax.f32 %v520_v36, 0.0 }
 0x109   : > { %v515_v42 = vadd.f32 %v2029_v43, %v514_v31  ;;  %v590_v50 = vmax.f32 %v512_v37, 0.0 }
 0x10a   : > { %v593_v53 = vmax.f32 %v523_v39, 0.0 }
 0x10b   : > { %v591_v56 = vmax.f32 %v515_v42, 0.0 }
 0x10d   : > { %v1695_v32 = vpop.f32.mrb[20].mxu0 }
 0x10e   : > { %v527_v33 = vpop.f32.mrb[21].mxu0  ;;  %v536_v59 = vadd.f32 %v1695_v32, %v2029_v43 }
 0x10f   : > { %v1696_v34 = vpop.f32.mrb[22].mxu0  ;;  %v528_v2 = vadd.f32 %v2029_v43, %v527_v33  ;;  %v1849_v33 = vld [vmem:[%s2336_s3 + $0xc0] sm:$0xff]  }
 0x110   : > { %v530_v35 = vpop.f32.mrb[23].mxu0  ;;  %v539_v8 = vadd.f32 %v1696_v34, %v2029_v43  ;;  %v596_v14 = vmax.f32 %v536_v59, 0.0  ;;  %1621 = vmatprep.subr.bf16.mxu1 %v1849_v33 }
 0x111   : > { %v531_v11 = vadd.f32 %v2029_v43, %v530_v35 }
 0x112   : > { %v597_v22 = vmax.f32 %v539_v8, 0.0 }
 0x113   : > { %v595_v28 = vmax.f32 %v531_v11, 0.0 }
 0x115   : > { %v1699_v38 = vpop.f32.mrb[24].mxu0 }
 0x116   : > { %v552_v40 = vadd.f32 %v1699_v38, %v2029_v43  ;;  %v543_v41 = vpop.f32.mrb[25].mxu0 }
 0x117   : > { %v544_v44 = vadd.f32 %v2029_v43, %v543_v41  ;;  %v1700_v45 = vpop.f32.mrb[26].mxu0 }
 0x118   : > { %v600_v47 = vmax.f32 %v552_v40, 0.0  ;;  %v555_v48 = vadd.f32 %v1700_v45, %v2029_v43  ;;  %v546_v49 = vpop.f32.mrb[27].mxu0  ;;  %v665_v40 = vld [vmem:[#allocation2 + $0x1] sm:$0xff] }
 0x119   : > { %v598_v51 = vmax.f32 %v544_v44, 0.0  ;;  %v547_v52 = vadd.f32 %v2029_v43, %v546_v49 }
 0x11a   : > { %v616_v54 = vmax.f32 %v592_v46, %v600_v47  ;;  %v601_v55 = vmax.f32 %v555_v48, 0.0 }
 0x11b   : > { %v614_v57 = vmax.f32 %v590_v50, %v598_v51  ;;  %v599_v58 = vmax.f32 %v547_v52, 0.0 }
 0x11c   : > { %v624_v60 = vmax.f32 %v2039_v61, %v616_v54  ;;  %v617_v62 = vmax.f32 %v593_v53, %v601_v55 }
 0x11d   : > { %v622_v4 = vmax.f32 %v2041_v0, %v614_v57  ;;  %v615_v6 = vmax.f32 %v591_v56, %v599_v58  ;;  %v1703_v7 = vpop.f32.mrb[28].mxu0 }
 0x11e   : > { %655 = vst.msk [vmem:[#allocation2 + $0x31] sm:$0xff] %vm630_vm1, %v624_v60  ;;  %v625_v61 = vmax.f32 %v2044_v3, %v617_v62  ;;  %v568_v9 = vadd.f32 %v1703_v7, %v2029_v43  ;;  %v559_v10 = vpop.f32.mrb[29].mxu0 }
 0x11f   : > { %653 = vst.msk [vmem:[#allocation2 + $0x11] sm:$0xff] %vm630_vm1, %v622_v4  ;;  %v623_v12 = vmax.f32 %v2047_v5, %v615_v6  ;;  %v560_v0 = vadd.f32 %v2029_v43, %v559_v10  ;;  %v1704_v13 = vpop.f32.mrb[30].mxu0  ;;  %v594_v5 = vmax.f32 %v528_v2, 0.0  ;;  %v790_v2 = vld [vmem:[#allocation2 + $0x92] sm:$0xff] }
 0x120   : > { %656 = vst.msk [vmem:[#allocation2 + $0x41] sm:$0xff] %vm630_vm1, %v625_v61  ;;  %v604_v15 = vmax.f32 %v568_v9, 0.0  ;;  %v571_v3 = vadd.f32 %v1704_v13, %v2029_v43  ;;  %v562_v16 = vpop.f32.mrb[31].mxu0 }
 0x121   : > { %654 = vst.msk [vmem:[#allocation2 + $0x21] sm:$0xff] %vm630_vm1, %v623_v12  ;;  %v602_v19 = vmax.f32 %v560_v0, 0.0  ;;  %v563_v20 = vadd.f32 %v2029_v43, %v562_v16 }
 0x122   : > { %v620_v23 = vmax.f32 %v596_v14, %v604_v15  ;;  %v605_v25 = vmax.f32 %v571_v3, 0.0  ;;  %v786_v14 = vld [vmem:[#allocation2 + $0x91] sm:$0xff] }
 0x123   : > { %v618_v29 = vmax.f32 %v594_v5, %v602_v19  ;;  %v603_v30 = vmax.f32 %v563_v20, 0.0  ;;  %v669_v5 = vld [vmem:[#allocation2 + $0x2] sm:$0xff] }
 0x124   : > { %v628_v31 = vmax.f32 %v2055_v21, %v620_v23  ;;  %v621_v32 = vmax.f32 %v597_v22, %v605_v25 }
 0x125   : > { %v626_v34 = vmax.f32 %v2057_v24, %v618_v29  ;;  %v619_v35 = vmax.f32 %v595_v28, %v603_v30  ;;  %v2104_v36 = vld [vmem:[#allocation2 + $0x30] sm:$0xff]  ;;  %v661_v29 = vld [vmem:[#allocation2] sm:$0xff] }
 0x126   : > { %659 = vst.msk [vmem:[#allocation2 + $0x71] sm:$0xff] %vm630_vm1, %v628_v31  ;;  %v629_v43 = vmax.f32 %v2059_v26, %v621_v32  ;;  %v2108_v37 = vld [vmem:[#allocation2 + $0x10] sm:$0xff] }
 0x127   : > { %657 = vst.msk [vmem:[#allocation2 + $0x51] sm:$0xff] %vm630_vm1, %v626_v34  ;;  %v627_v21 = vmax.f32 %v2061_v27, %v619_v35  ;;  %v1731_v38 = vpack.i.bf16 %v2104_v36, %v2108_v37  ;;  %v2114_v39 = vld [vmem:[#allocation2 + $0x42] sm:$0xff]  ;;  %v2153_v56 = vld [vmem:[#allocation2 + $0x32] sm:$0xff] }
 0x128   : > { %660 = vst.msk [vmem:[#allocation2 + $0x81] sm:$0xff] %vm630_vm1, %v629_v43  ;;  %v2117_v24 = vld [vmem:[#allocation2 + $0x22] sm:$0xff]  ;;  %v2165_v62 = vld [vmem:[#allocation2 + $0x11] sm:$0xff] }
 0x129   : > { %v2119_v41 = vld [vmem:[#allocation2 + $0x21] sm:$0xff]  ;;  %658 = vst.msk [vmem:[#allocation2 + $0x61] sm:$0xff] %vm630_vm1, %v627_v21  ;;  %1732 = vrot.lane.b32.xlu0 %v1731_v38, %s1874_s27  ;;  %v875_v26 = vpack.c.bf16 %v2114_v39, %v2117_v24  ;;  %v2167_v63 = vld [vmem:[#allocation2 + $0x31] sm:$0xff]  ;;  %v1796_v16 = vpack.i.bf16 %v2114_v39, %v2117_v24 }
 0x12a   : > { %v1736_v27 = vpack.i.bf16 %v2119_v41, %v665_v40  ;;  %v2127_v42 = vld [vmem:[#allocation2 + $0x20] sm:$0xff]  ;;  %v1756_v4 = vpack.i.bf16 %v2167_v63, %v2165_v62  ;;  %v681_v12 = vld [vmem:[#allocation2 + $0x12] sm:$0xff]  ;;  %v1851_v38 = vld [vmem:[%s2336_s3 + $0xc8] sm:$0xff]  }
 0x12b   : > { %1713 = vmatprep.mubr.msk.bf16.mxu0 %vm630_vm1, %v875_v26  ;;  %v2129_v44 = vld [vmem:[#allocation2 + $0x40] sm:$0xff]  ;;  %v1776_v0 = vpack.i.bf16 %v2153_v56, %v681_v12 }
 0x12c   : > { %v1751_v48 = vpack.i.bf16 %v2129_v44, %v2127_v42  ;;  %v2157_v58 = vld [vmem:[#allocation2 + $0x41] sm:$0xff] }
 0x12d   : > { %1737 = vrot.lane.b32.xlu0 %v1736_v27, %s1874_s27  ;;  %v2132_v45 = vld [vmem:[#allocation2 + $0x70] sm:$0xff]  ;;  %v1771_v6 = vpack.i.bf16 %v2157_v58, %v2119_v41  ;;  %v1850_v34 = vld [vmem:[%s2336_s3 + $0x80] sm:$0xff]  }
 0x12e   : > { %v2134_v46 = vld [vmem:[#allocation2 + $0x50] sm:$0xff] }
 0x12f   : > { %v1741_v47 = vpack.i.bf16 %v2132_v45, %v2134_v46  ;;  %v697_v49 = vld [vmem:[#allocation2 + $0x82] sm:$0xff]  ;;  %v2140_v50 = vld [vmem:[#allocation2 + $0x52] sm:$0xff] }
 0x130   : > { %v2142_v51 = vld [vmem:[#allocation2 + $0x80] sm:$0xff]  ;;  %v885_v57 = vpack.c.bf16 %v2140_v50, %v2153_v56  ;;  %v2171_v1 = vld [vmem:[#allocation2 + $0x72] sm:$0xff] }
 0x131   : > { %v2144_v52 = vld [vmem:[#allocation2 + $0x62] sm:$0xff]  ;;  %1742 = vrot.lane.b32.xlu1 %v1741_v47, %s1874_s27  ;;  %1752 = vrot.lane.b32.xlu0 %v1751_v48, %s1874_s27  ;;  %v2177_v7 = vld [vmem:[#allocation2 + $0x51] sm:$0xff]  ;;  %v890_v9 = vpack.c.bf16 %v790_v2, %v2171_v1  ;;  %v1786_v15 = vpack.i.bf16 %v2171_v1, %v2140_v50 }
 0x132   : > { %v2146_v53 = vld [vmem:[#allocation2 + $0x61] sm:$0xff]  ;;  %v880_v55 = vpack.c.bf16 %v697_v49, %v2144_v52  ;;  %v2179_v8 = vld [vmem:[#allocation2 + $0x71] sm:$0xff]  ;;  %v1791_v13 = vpack.i.bf16 %v2177_v7, %v2167_v63  ;;  %v1806_v17 = vpack.i.bf16 %v697_v49, %v2144_v52 }
 0x133   : > { %v2148_v54 = vld [vmem:[#allocation2 + $0x60] sm:$0xff]  ;;  %v1746_v59 = vpack.i.bf16 %v2146_v53, %v2157_v58  ;;  %v1766_v10 = vpack.i.bf16 %v2179_v8, %v2177_v7  ;;  %v1801_v3 = vpack.i.bf16 %v786_v14, %v2179_v8  ;;  %v1852_v49 = vld [vmem:[%s2336_s3 + $0x88] sm:$0xff]  }
 0x134   : > { %1714 = vmatmul.mubr.msk.bf16.vlgmr.msra.gmra.mrb[32].mxu0 %vm630_vm1, %v880_v55  ;;  %v1761_v60 = vpack.i.bf16 %v2142_v51, %v2148_v54  ;;  %v2181_v61 = vld [vmem:[#allocation2 + $0x81] sm:$0xff] }
 0x135   : > { %1717 = vmatprep.mubr.msk.bf16.mxu0 %vm630_vm1, %v885_v57  ;;  %1747 = vrot.lane.b32.xlu1 %v1746_v59, %s1874_s27  ;;  %v1781_v11 = vpack.i.bf16 %v2181_v61, %v2146_v53  ;;  %v1853_v59 = vld [vmem:[%s2336_s3 + $0xd0] sm:$0xff]  }
 0x136   : > { %1762 = vrot.lane.b32.xlu0 %v1761_v60, %s1874_s27 }
 0x139   : > { %1757 = vrot.lane.b32.xlu1 %v1756_v4, %s1874_s27 }
 0x13a   : > { %1772 = vrot.lane.b32.xlu0 %v1771_v6, %s1874_s27 }
 0x13c   : > { %1718 = vmatmul.mubr.msk.bf16.gmra.mrb[36].mxu0 %vm630_vm1, %v890_v9 }
 0x13d   : > { %1767 = vrot.lane.b32.xlu1 %v1766_v10, %s1874_s27  ;;  %v1854_v10 = vld [vmem:[%s2336_s3 + $0x90] sm:$0xff]  }
 0x13e   : > { %1782 = vrot.lane.b32.xlu0 %v1781_v11, %s1874_s27 }
 0x141   : > { %1777 = vrot.lane.b32.xlu1 %v1776_v0, %s1874_s27 }
 0x142   : > { %1792 = vrot.lane.b32.xlu0 %v1791_v13, %s1874_s27 }
 0x145   : > { %1787 = vrot.lane.b32.xlu1 %v1786_v15, %s1874_s27 }
 0x146   : > { %1802 = vrot.lane.b32.xlu0 %v1801_v3, %s1874_s27 }
 0x149   : > { %1797 = vrot.lane.b32.xlu1 %v1796_v16, %s1874_s27  ;;  %v1856_v16 = vld [vmem:[%s2336_s3 + $0x98] sm:$0xff]  }
 0x14d   : > { %1807 = vrot.lane.b32.xlu1 %v1806_v17, %s1874_s27  ;;  %v1857_v17 = vld [vmem:[%s2336_s3 + $0xe0] sm:$0xff]  }
 0x19b   : > { %v1733_v18 = vpop.permute.xlu0 %1732 }
 0x19c   : > { %v1735_v19 = vunpack.i.h.bf16 %v1733_v18  ;;  %v1734_v20 = vunpack.i.l.bf16 %v1733_v18 }
 0x19e   : > { %v766_v22 = vsel %vm630_vm1, %v669_v5, %v1734_v20  ;;  %v767_v23 = vsel %vm630_vm1, %v2117_v24, %v1735_v19 }
 0x19f   : > { %v1738_v25 = vpop.permute.xlu0 %1737  ;;  %v872_v28 = vpack.c.bf16 %v767_v23, %v766_v22 }
 0x1a0   : > { %v1740_v30 = vunpack.i.h.bf16 %v1738_v25  ;;  %v1739_v31 = vunpack.i.l.bf16 %v1738_v25  ;;  %v1858_v25 = vld [vmem:[%s2336_s3 + $0xa0] sm:$0xff]  }
 0x1a1   : > { %1230 = vmatprep.mubr.bf16.mxu1 %v872_v28 }
 0x1a2   : > { %v762_v32 = vsel %vm630_vm1, %v661_v29, %v1739_v31  ;;  %v763_v33 = vsel %vm630_vm1, %v2127_v42, %v1740_v30 }
 0x1a3   : > { %v1743_v35 = vpop.permute.xlu1 %1742  ;;  %v1753_v43 = vpop.permute.xlu0 %1752  ;;  %v871_v21 = vpack.c.bf16 %v763_v33, %v762_v32  ;;  %v1861_v33 = vld [vmem:[%s2336_s3 + $0xf0] sm:$0xff]  }
 0x1a4   : > { %v1745_v24 = vunpack.i.h.bf16 %v1743_v35  ;;  %v1744_v40 = vunpack.i.l.bf16 %v1743_v35  ;;  %v1755_v26 = vunpack.i.h.bf16 %v1753_v43  ;;  %v1754_v27 = vunpack.i.l.bf16 %v1753_v43 }
 0x1a5   : > { %1231 = vmatmul.mubr.bf16.vlgmr.msra.gmra.mrb[0].mxu1 %v871_v21 }
 0x1a6   : > { %1622 = vmatpush3.bf16.msra.mxu1 %v1850_v34  ;;  %v768_v47 = vsel %vm630_vm1, %v2114_v39, %v1744_v40  ;;  %v769_v48 = vsel %vm630_vm1, %v2144_v52, %v1745_v24  ;;  %v859_v4 = vsel %vm630_vm1, %v681_v12, %v1754_v27  ;;  %v860_v39 = vsel %vm630_vm1, %v2153_v56, %v1755_v26  ;;  %v1855_v12 = vld [vmem:[%s2336_s3 + $0xd8] sm:$0xff]   ;;  %v1862_v40 = vld [vmem:[%s2336_s3 + $0xb0] sm:$0xff]  }
 0x1a7   : > { %v1748_v55 = vpop.permute.xlu1 %1747  ;;  %1623 = vmatprep.subr.bf16.mxu1 %v1851_v38  ;;  %v877_v57 = vpack.c.bf16 %v769_v48, %v768_v47  ;;  %v882_v14 = vpack.c.bf16 %v860_v39, %v859_v4  ;;  %v1863_v27 = vld [vmem:[%s2336_s3 + $0xf8] sm:$0xff]  }
 0x1a8   : > { %v1750_v60 = vunpack.i.h.bf16 %v1748_v55  ;;  %v1749_v2 = vunpack.i.l.bf16 %v1748_v55  ;;  %v1763_v52 = vpop.permute.xlu0 %1762 }
 0x1a9   : > { %1238 = vmatprep.mubr.bf16.mxu1 %v877_v57  ;;  %v1765_v15 = vunpack.i.h.bf16 %v1763_v52  ;;  %v1764_v3 = vunpack.i.l.bf16 %v1763_v52 }
 0x1aa   : > { %1624 = vmatpush3.bf16.msra.mxu1 %v1852_v49  ;;  %v764_v6 = vsel %vm630_vm1, %v2129_v44, %v1749_v2  ;;  %v765_v9 = vsel %vm630_vm1, %v2148_v54, %v1750_v60 }
 0x1ab   : > { %v1758_v11 = vpop.permute.xlu1 %1757  ;;  %1625 = vmatprep.subr.bf16.mxu1 %v1853_v59  ;;  %v876_v0 = vpack.c.bf16 %v765_v9, %v764_v6  ;;  %v861_v20 = vsel %vm630_vm1, %v2140_v50, %v1764_v3  ;;  %v862_v22 = vsel %vm630_vm1, %v2171_v1, %v1765_v15  ;;  %v1860_v1 = vld [vmem:[%s2336_s3 + $0xa8] sm:$0xff]  }
 0x1ac   : > { %v1760_v56 = vunpack.i.h.bf16 %v1758_v11  ;;  %v1759_v13 = vunpack.i.l.bf16 %v1758_v11  ;;  %v1773_v23 = vpop.permute.xlu0 %1772  ;;  %v887_v31 = vpack.c.bf16 %v862_v22, %v861_v20 }
 0x1ad   : > { %1239 = vmatmul.mubr.bf16.gmra.mrb[4].mxu1 %v876_v0  ;;  %v1775_v32 = vunpack.i.h.bf16 %v1773_v23  ;;  %v1774_v50 = vunpack.i.l.bf16 %v1773_v23 }
 0x1ae   : > { %1626 = vmatpush3.bf16.msra.mxu1 %v1854_v10  ;;  %1246 = vmatprep.mubr.bf16.mxu1 %v882_v14  ;;  %v855_v18 = vsel %vm630_vm1, %v2108_v37, %v1759_v13  ;;  %v856_v5 = vsel %vm630_vm1, %v2104_v36, %v1760_v56  ;;  %v1859_v37 = vld [vmem:[%s2336_s3 + $0xe8] sm:$0xff]  }
 0x1af   : > { %1627 = vmatprep.subr.bf16.mxu1 %v1855_v12  ;;  %v1768_v19 = vpop.permute.xlu1 %1767  ;;  %v881_v28 = vpack.c.bf16 %v856_v5, %v855_v18  ;;  %v774_v21 = vsel %vm630_vm1, %v2127_v42, %v1774_v50  ;;  %v775_v38 = vsel %vm630_vm1, %v2129_v44, %v1775_v32  ;;  %v1864_v44 = vld [vmem:[%s2336_s3 + $0xb8] sm:$0xff]  }
 0x1b0   : > { %v1770_v29 = vunpack.i.h.bf16 %v1768_v19  ;;  %v1769_v30 = vunpack.i.l.bf16 %v1768_v19  ;;  %v1783_v24 = vpop.permute.xlu0 %1782  ;;  %v874_v49 = vpack.c.bf16 %v775_v38, %v774_v21 }
 0x1b1   : > { %v1785_v55 = vunpack.i.h.bf16 %v1783_v24  ;;  %v1784_v42 = vunpack.i.l.bf16 %v1783_v24 }
 0x1b2   : > { %1628 = vmatpush3.bf16.msra.mxu1 %v1856_v16  ;;  %v857_v34 = vsel %vm630_vm1, %v2134_v46, %v1769_v30  ;;  %v858_v35 = vsel %vm630_vm1, %v2132_v45, %v1770_v29 }
 0x1b3   : > { %1629 = vmatprep.subr.bf16.mxu1 %v1857_v17  ;;  %v1778_v43 = vpop.permute.xlu1 %1777  ;;  %v886_v26 = vpack.c.bf16 %v858_v35, %v857_v34  ;;  %v776_v2 = vsel %vm630_vm1, %v2148_v54, %v1784_v42  ;;  %v777_v4 = vsel %vm630_vm1, %v2142_v51, %v1785_v55 }
 0x1b4   : > { %v1780_v47 = vunpack.i.h.bf16 %v1778_v43  ;;  %v1779_v48 = vunpack.i.l.bf16 %v1778_v43  ;;  %v1793_v39 = vpop.permute.xlu0 %1792  ;;  %v879_v10 = vpack.c.bf16 %v777_v4, %v776_v2 }
 0x1b5   : > { %1247 = vmatmul.mubr.bf16.gmra.mrb[8].mxu1 %v881_v28  ;;  %v1795_v11 = vunpack.i.h.bf16 %v1793_v39  ;;  %v1794_v0 = vunpack.i.l.bf16 %v1793_v39  ;;  %v1520_v39 = vld [vmem:[%s2337_s4] ss:$0 sm:$0xff] }
 0x1b6   : > { %1630 = vmatpush3.bf16.msra.mxu1 %v1858_v25  ;;  %1254 = vmatprep.mubr.bf16.mxu1 %v887_v31  ;;  %v771_v57 = vsel %vm630_vm1, %v2167_v63, %v1780_v47  ;;  %v770_v59 = vsel %vm630_vm1, %v2165_v62, %v1779_v48 }
 0x1b7   : > { %1631 = vmatprep.subr.bf16.mxu1 %v1859_v37  ;;  %v1788_v60 = vpop.permute.xlu1 %1787  ;;  %v873_v52 = vpack.c.bf16 %v771_v57, %v770_v59  ;;  %v867_v51 = vsel %vm630_vm1, %v2104_v36, %v1794_v0  ;;  %v868_v12 = vsel %vm630_vm1, %v2134_v46, %v1795_v11 }
 0x1b8   : > { %v1790_v6 = vunpack.i.h.bf16 %v1788_v60  ;;  %v1789_v9 = vunpack.i.l.bf16 %v1788_v60  ;;  %v1803_v56 = vpop.permute.xlu0 %1802  ;;  %v884_v3 = vpack.c.bf16 %v868_v12, %v867_v51 }
 0x1b9   : > { %v1805_v16 = vunpack.i.h.bf16 %v1803_v56  ;;  %v1804_v17 = vunpack.i.l.bf16 %v1803_v56 }
 0x1ba   : > { %1632 = vmatpush3.bf16.msra.mxu1 %v1860_v1  ;;  %v772_v62 = vsel %vm630_vm1, %v2177_v7, %v1789_v9  ;;  %v773_v63 = vsel %vm630_vm1, %v2179_v8, %v1790_v6  ;;  %v782_v7 = vld [vmem:[#allocation2 + $0x90] sm:$0xff] }
 0x1bb   : > { %1633 = vmatprep.subr.bf16.mxu1 %v1861_v33  ;;  %v1798_v54 = vpop.permute.xlu1 %1797  ;;  %v878_v13 = vpack.c.bf16 %v773_v63, %v772_v62  ;;  %v869_v46 = vsel %vm630_vm1, %v2132_v45, %v1804_v17  ;;  %v870_v5 = vsel %vm630_vm1, %v782_v7, %v1805_v16 }
 0x1bc   : > { %v1800_v14 = vunpack.i.h.bf16 %v1798_v54  ;;  %v1799_v15 = vunpack.i.l.bf16 %v1798_v54  ;;  %v889_v23 = vpack.c.bf16 %v870_v5, %v869_v46 }
 0x1bd   : > { %1255 = vmatmul.mubr.bf16.gmra.mrb[12].mxu1 %v886_v26 }
 0x1be   : > { %1634 = vmatpush3.bf16.msra.mxu1 %v1862_v40  ;;  %1295 = vmatprep.mubr.bf16.mxu1 %v874_v49  ;;  %v863_v8 = vsel %vm630_vm1, %v2119_v41, %v1799_v15  ;;  %v864_v18 = vsel %vm630_vm1, %v2157_v58, %v1800_v14 }
 0x1bf   : > { %1635 = vmatprep.subr.bf16.mxu1 %v1863_v27  ;;  %v1808_v36 = vpop.permute.xlu1 %1807  ;;  %v883_v19 = vpack.c.bf16 %v864_v18, %v863_v8 }
 0x1c0   : > { %v1810_v20 = vunpack.i.h.bf16 %v1808_v36  ;;  %v1809_v22 = vunpack.i.l.bf16 %v1808_v36 }
 0x1c2   : > { %1636 = vmatpush3.bf16.msra.mxu1 %v1864_v44  ;;  %v865_v25 = vsel %vm630_vm1, %v2146_v53, %v1809_v22  ;;  %v866_v41 = vsel %vm630_vm1, %v2181_v61, %v1810_v20 }
 0x1c3   : > { %v888_v28 = vpack.c.bf16 %v866_v41, %v865_v25 }
 0x1c5   : > { %1296 = vmatmul.mubr.bf16.vlgmr.msra.gmra.mrb[16].mxu1 %v873_v52 }
 0x1c6   : > { %1303 = vmatprep.mubr.bf16.mxu1 %v879_v10 }
 0x1cd   : > { %1304 = vmatmul.mubr.bf16.gmra.mrb[20].mxu1 %v878_v13 }
 0x1ce   : > { %1311 = vmatprep.mubr.bf16.mxu1 %v884_v3 }
 0x1d5   : > { %1312 = vmatmul.mubr.bf16.gmra.mrb[24].mxu1 %v883_v19 }
 0x1d6   : > { %1319 = vmatprep.mubr.bf16.mxu1 %v889_v23 }
 0x1dd   : > { %1320 = vmatmul.mubr.bf16.gmra.mrb[28].mxu1 %v888_v28 }
 0x207   : > { %v1715_v58 = vpop.f32.mrb[32].mxu0 }
 0x208   : > { %v1362_v37 = vpop.f32.mrb[33].mxu0 }
 0x209   : > { %v1716_v29 = vpop.f32.mrb[34].mxu0 }
 0x20a   : > { %v1365_v45 = vpop.f32.mrb[35].mxu0 }
 0x20f   : > { %v2313_v30 = vpop.f32.mrb[36].mxu0 }
 0x210   : > { %v1378_v31 = vpop.f32.mrb[37].mxu0 }
 0x211   : > { %v2315_v32 = vpop.f32.mrb[38].mxu0 }
 0x212   : > { %v2317_v50 = vpop.f32.mrb[39].mxu0 }
 0x278   : > { %v1597_v1 = vpop.f32.mrb[0].mxu1 }
 0x279   : > { %v1598_v33 = vpop.f32.mrb[1].mxu1 }
 0x27a   : > { %v1599_v34 = vadd.f32 %v1598_v33, %v1597_v1  ;;  %v1600_v53 = vpop.f32.mrb[2].mxu1 }
 0x27b   : > { %v1601_v35 = vpop.f32.mrb[3].mxu1 }
 0x27c   : > { %v1602_v43 = vadd.f32 %v1601_v35, %v1600_v53  ;;  %v1233_v9 = vadd.f32 %v1599_v34, %v1520_v39 }
 0x27e   : > { %v1236_v62 = vadd.f32 %v1602_v43, %v1520_v39 }
 0x280   : > { %v1603_v61 = vpop.f32.mrb[4].mxu1 }
 0x281   : > { %v1604_v21 = vpop.f32.mrb[5].mxu1 }
 0x282   : > { %v1605_v38 = vadd.f32 %v1604_v21, %v1603_v61  ;;  %v1606_v24 = vpop.f32.mrb[6].mxu1 }
 0x283   : > { %v1607_v40 = vpop.f32.mrb[7].mxu1 }
 0x284   : > { %v1608_v26 = vadd.f32 %v1607_v40, %v1606_v24  ;;  %v1241_v15 = vadd.f32 %v1605_v38, %v1520_v39 }
 0x286   : > { %v1244_v7 = vadd.f32 %v1608_v26, %v1520_v39 }
 0x288   : > { %v1609_v27 = vpop.f32.mrb[8].mxu1 }
 0x289   : > { %v1610_v47 = vpop.f32.mrb[9].mxu1 }
 0x28a   : > { %v1611_v48 = vadd.f32 %v1610_v47, %v1609_v27  ;;  %v1612_v49 = vpop.f32.mrb[10].mxu1 }
 0x28b   : > { %v1613_v55 = vpop.f32.mrb[11].mxu1 }
 0x28c   : > { %v1614_v42 = vadd.f32 %v1613_v55, %v1612_v49  ;;  %v1249_v22 = vadd.f32 %v1611_v48, %v1520_v39 }
 0x28e   : > { %v1252_v28 = vadd.f32 %v1614_v42, %v1520_v39 }
 0x290   : > { %v1615_v44 = vpop.f32.mrb[12].mxu1 }
 0x291   : > { %v1616_v57 = vpop.f32.mrb[13].mxu1 }
 0x292   : > { %v1617_v59 = vadd.f32 %v1616_v57, %v1615_v44  ;;  %v1618_v60 = vpop.f32.mrb[14].mxu1 }
 0x293   : > { %v1619_v2 = vpop.f32.mrb[15].mxu1 }
 0x294   : > { %v1620_v4 = vadd.f32 %v1619_v2, %v1618_v60  ;;  %v1257_v43 = vadd.f32 %v1617_v59, %v1520_v39 }
 0x296   : > { %v1260_v27 = vadd.f32 %v1620_v4, %v1520_v39 }
 0x298   : > { %v1637_v52 = vpop.f32.mrb[16].mxu1 }
 0x299   : > { %v1638_v6 = vpop.f32.mrb[17].mxu1 }
 0x29a   : > { %v1639_v10 = vadd.f32 %v1638_v6, %v1637_v52  ;;  %v1640_v11 = vpop.f32.mrb[18].mxu1 }
 0x29b   : > { %v1641_v0 = vpop.f32.mrb[19].mxu1 }
 0x29c   : > { %v1298_v63 = vadd.f32 %v1639_v10, %v1233_v9  ;;  %v1642_v54 = vadd.f32 %v1641_v0, %v1640_v11 }
 0x29e   : > { %v1363_v51 = vadd.f32 %v1362_v37, %v1298_v63  ;;  %v1301_v12 = vadd.f32 %v1642_v54, %v1236_v62 }
 0x2a0   : > { %v1366_v56 = vadd.f32 %v1365_v45, %v1301_v12  ;;  %v1643_v13 = vpop.f32.mrb[20].mxu1  ;;  %v1393_v34 = vmax.f32 %v1363_v51, 0.0 }
 0x2a1   : > { %v1644_v14 = vpop.f32.mrb[21].mxu1 }
 0x2a2   : > { %v1645_v3 = vadd.f32 %v1644_v14, %v1643_v13  ;;  %v1646_v16 = vpop.f32.mrb[22].mxu1  ;;  %v1394_v61 = vmax.f32 %v1366_v56, 0.0 }
 0x2a3   : > { %v1647_v17 = vpop.f32.mrb[23].mxu1 }
 0x2a4   : > { %v1306_v8 = vadd.f32 %v1645_v3, %v1241_v15  ;;  %v1648_v18 = vadd.f32 %v1647_v17, %v1646_v16 }
 0x2a6   : > { %v1371_v36 = vadd.f32 %v1715_v58, %v1306_v8  ;;  %v1309_v46 = vadd.f32 %v1648_v18, %v1244_v7 }
 0x2a8   : > { %v1374_v5 = vadd.f32 %v1716_v29, %v1309_v46  ;;  %v1649_v19 = vpop.f32.mrb[24].mxu1  ;;  %v1395_v55 = vmax.f32 %v1371_v36, 0.0 }
 0x2a9   : > { %v1650_v20 = vpop.f32.mrb[25].mxu1 }
 0x2aa   : > { %v1651_v23 = vadd.f32 %v1650_v20, %v1649_v19  ;;  %v1652_v25 = vpop.f32.mrb[26].mxu1  ;;  %v1396_v57 = vmax.f32 %v1374_v5, 0.0 }
 0x2ab   : > { %v1653_v41 = vpop.f32.mrb[27].mxu1 }
 0x2ac   : > { %v1314_v37 = vadd.f32 %v1651_v23, %v1249_v22  ;;  %v1654_v45 = vadd.f32 %v1653_v41, %v1652_v25 }
 0x2ae   : > { %v1379_v1 = vadd.f32 %v1378_v31, %v1314_v37  ;;  %v1317_v33 = vadd.f32 %v1654_v45, %v1252_v28 }
 0x2b0   : > { %v1397_v53 = vmax.f32 %v1379_v1, 0.0  ;;  %v1382_v35 = vadd.f32 %v2317_v50, %v1317_v33  ;;  %v1655_v58 = vpop.f32.mrb[28].mxu1 }
 0x2b1   : > { %v1656_v29 = vpop.f32.mrb[29].mxu1 }
 0x2b2   : > { %v1401_v21 = vmax.f32 %v1393_v34, %v1397_v53  ;;  %v1398_v38 = vmax.f32 %v1382_v35, 0.0  ;;  %v1657_v24 = vadd.f32 %v1656_v29, %v1655_v58  ;;  %v1658_v40 = vpop.f32.mrb[30].mxu1 }
 0x2b3   : > { %v1659_v26 = vpop.f32.mrb[31].mxu1 }
 0x2b4   : > { %1405 = vst [vmem:[#allocation3] sm:$0xff] %v1401_v21  ;;  %v1402_v31 = vmax.f32 %v1394_v61, %v1398_v38  ;;  %v1322_v47 = vadd.f32 %v1657_v24, %v1257_v43  ;;  %v1660_v48 = vadd.f32 %v1659_v26, %v1658_v40 }
 0x2b6   : > { %1406 = vst [vmem:[#allocation3 + $0x8] sm:$0xff] %v1402_v31  ;;  %v1387_v49 = vadd.f32 %v2313_v30, %v1322_v47  ;;  %v1325_v50 = vadd.f32 %v1660_v48, %v1260_v27 }
 0x2b8   : > { %v1399_v42 = vmax.f32 %v1387_v49, 0.0  ;;  %v1390_v44 = vadd.f32 %v2315_v32, %v1325_v50 }
 0x2ba   : > { %v1403_v59 = vmax.f32 %v1395_v55, %v1399_v42  ;;  %v1400_v60 = vmax.f32 %v1390_v44, 0.0 }
 0x2bc   : > { %1407 = vst [vmem:[#allocation3 + $0x10] sm:$0xff] %v1403_v59  ;;  %v1404_v2 = vmax.f32 %v1396_v57, %v1400_v60 }
 0x2bd   : > { %v1409_v4 = vld [vmem:[#allocation3] ss:$2 sm:$0xff]  ;;  %v1413_v39 = vld [vmem:[#allocation3 + $0x1] ss:$2 sm:$0xff] }
 0x2be   : > { %v1416_v52 = vmax.f32 %v1409_v4, %v1413_v39  ;;  %1408 = vst [vmem:[#allocation3 + $0x18] sm:$0xff] %v1404_v2 }
 0x2c0   : > { %1418 = vst [vmem:[%s226_s15] sm:$0xff] %v1416_v52 }
 0x2c5   : > { %v1411_v30 = vld [vmem:[#allocation3 + $0x10] ss:$2 sm:$0xff]  ;;  %v1415_v6 = vld [vmem:[#allocation3 + $0x11] ss:$2 sm:$0xff] }
 0x2c6   : > { %v1417_v9 = vmax.f32 %v1411_v30, %v1415_v6 }
 0x2c8   : > { %1419 = vst [vmem:[%s226_s15 + $0x8] sm:$0xff] %v1417_v9 }
 0x2c9 PF: > { %s15_s18 = sadd.s32 1, %s1871_s18  }
 0x2ca   : > { %p12_p5 = scmp.ge.s32.totalorder %s15_s18, 4  }
 0x2cc   :  { %14 = sbr.rel (!%p12_p5) target bundleno = 1 (0x1), region = 76 }

</bundles_post_ra>
